<compile_context>
chip_gen: v6e
topology: v6e:2x2x1
jax: 0.10.0
libtpu: 0.0.40
codegen_flags: <defaults>
</compile_context>

<pallas_src>
import numpy as np
import jax
import jax.numpy as jnp
from jax.experimental import pallas as pl
from jax.experimental.pallas import tpu as pltpu


def _round_up(n: int, m: int) -> int:
    return ((n + m - 1) // m) * m


def _cdiv(a: int, b: int) -> int:
    return (a + b - 1) // b


def beam_classifier_kernel(x_ref, w1_ref, b1_ref, w2_ref, b2_ref, w3_ref, b3_ref, o_ref):
    # In-kernel bf16 cast of the streamed f32 x tile (VPU cast hidden under the MXU).
    x = x_ref[...].astype(w1_ref.dtype)
    # dense1 + ReLU (bf16 MXU matmul, f32 accumulate / bias / ReLU)
    h1 = jnp.dot(x, w1_ref[...], preferred_element_type=jnp.float32) + b1_ref[...]
    h1 = jnp.maximum(h1, 0.0)
    # dense2 + ReLU
    h2 = jnp.dot(h1.astype(w2_ref.dtype), w2_ref[...],
                 preferred_element_type=jnp.float32) + b2_ref[...]
    h2 = jnp.maximum(h2, 0.0)
    # dense3 (logits, no activation)
    o_ref[...] = (jnp.dot(h2.astype(w3_ref.dtype), w3_ref[...],
                          preferred_element_type=jnp.float32) + b3_ref[...]).astype(o_ref.dtype)


def prepare_widened_params(params, *, pack: int = 8, weight_dtype=jnp.bfloat16):
    """Build block-diagonal weights kron(I_pack, W) and lane-tiled biases ONCE.

    Cache/reuse the returned dict across forward calls (don't rebuild per invocation).
    """
    def block_diag(w):   # [pack*fin, pack*fout] block-diagonal == exact per-row matmul
        return jnp.kron(jnp.eye(pack, dtype=jnp.float32),
                        w.astype(jnp.float32)).astype(weight_dtype)

    def tile_bias(b):    # [1, pack*fout], kept f32 (bias/ReLU stay on f32 accumulator)
        return jnp.tile(b.astype(jnp.float32).reshape(1, -1), (1, pack))

    return {
        "pack": pack,
        "in_f": int(params["w1"].shape[0]),
        "hid": int(params["w1"].shape[1]),
        "num_beam": int(params["w3"].shape[1]),
        "w1": block_diag(params["w1"]), "b1": tile_bias(params["b1"]),
        "w2": block_diag(params["w2"]), "b2": tile_bias(params["b2"]),
        "w3": block_diag(params["w3"]), "b3": tile_bias(params["b3"]),
    }


def _choose_wide_tiling(batch, pack, in_f, hid, num_beam, out_itemsize, *,
                        target_steps=8, max_tbw=4096, min_tbw=16,
                        vmem_budget_bytes=24 * 1024 * 1024):
    """Pick the wide-row tile (tbw) and padded wide-row count."""
    wide_needed = _cdiv(batch, pack)

    # VMEM-aware cap: double-buffered f32 x + out blocks, f32 hidden temporaries, bf16 x copy.
    bytes_per_wide_row = (2 * pack * in_f * 4
                          + 2 * pack * num_beam * out_itemsize
                          + 2 * pack * hid * 4
                          + pack * in_f * 2)
    cap = max(min_tbw, (vmem_budget_bytes // bytes_per_wide_row) // min_tbw * min_tbw)
    max_tbw = max(min_tbw, min(max_tbw, cap))

    if wide_needed < 2 * min_tbw:
        # Too small to split into >1 legal (multiple-of-16 sublane) tile: single
        # full-extent block.  (Launch overhead dominates here anyway.)
        return wide_needed, wide_needed

    tbw = min(max_tbw, _round_up(_cdiv(wide_needed, target_steps), min_tbw))
    wide_pad = _round_up(wide_needed, tbw)
    return tbw, wide_pad


def beam_classifier_forward(x, wide_params, *, out_dtype=jnp.float32,
                            target_steps: int = 8, max_tbw: int = 4096):
    """x: [batch, in_features] float32.  Computes relu(relu(x@w1+b1)@w2+b2)@w3+b3
    with bf16 operands / f32 accumulation, streaming the batch through VMEM."""
    pack = wide_params["pack"]
    in_f = wide_params["in_f"]
    hid = wide_params["hid"]
    num_beam = wide_params["num_beam"]

    batch = x.shape[0]
    assert x.shape[1] == in_f

    out_itemsize = np.dtype(out_dtype).itemsize
    tbw, wide_pad = _choose_wide_tiling(batch, pack, in_f, hid, num_beam, out_itemsize,
                                        target_steps=target_steps, max_tbw=max_tbw)
    batch_pad = wide_pad * pack
    if batch_pad != batch:                      # only pad when strictly required
        x = jnp.pad(x, ((0, batch_pad - batch), (0, 0)))

    # Lane-dense "wide" layout: pack rows folded into the lane axis.  Row-major
    # reshape only (free reinterpretation); NO wrapper-side dtype cast.
    x_wide = x.reshape(wide_pad, pack * in_f)

    grid = (wide_pad // tbw,)

    x_spec = pl.BlockSpec((tbw, pack * in_f), lambda i: (i, 0))
    out_spec = pl.BlockSpec((tbw, pack * num_beam), lambda i: (i, 0))

    def resident(a):     # whole array, constant block index -> DMA'd once, stays in VMEM
        return pl.BlockSpec(a.shape, lambda i: (0, 0))

    w1w, b1w = wide_params["w1"], wide_params["b1"]
    w2w, b2w = wide_params["w2"], wide_params["b2"]
    w3w, b3w = wide_params["w3"], wide_params["b3"]

    flops = 2 * wide_pad * ((pack * in_f) * (pack * hid)
                            + (pack * hid) * (pack * hid)
                            + (pack * hid) * (pack * num_beam))
    bytes_accessed = (x_wide.size * 4
                      + wide_pad * pack * num_beam * out_itemsize
                      + (w1w.size + w2w.size + w3w.size) * np.dtype(w1w.dtype).itemsize
                      + (b1w.size + b2w.size + b3w.size) * 4)

    out_wide = pl.pallas_call(
        beam_classifier_kernel,
        out_shape=jax.ShapeDtypeStruct((wide_pad, pack * num_beam), out_dtype),
        grid=grid,
        in_specs=[x_spec,
                  resident(w1w), resident(b1w),
                  resident(w2w), resident(b2w),
                  resident(w3w), resident(b3w)],
        out_specs=out_spec,
        compiler_params=pltpu.CompilerParams(dimension_semantics=("parallel",)),
        cost_estimate=pl.CostEstimate(flops=flops, transcendentals=0,
                                      bytes_accessed=bytes_accessed),
    )(x_wide, w1w, b1w, w2w, b2w, w3w, b3w)

    return out_wide.reshape(batch_pad, num_beam)[:batch]


def init_params(key, in_features, num_antenna, num_beam):
    """Deterministic synthetic parameter init (PyTorch-Linear-like uniform ranges)."""
    hidden = num_antenna * 5
    ks = jax.random.split(key, 6)

    def lin(kw, kb, fan_in, fan_out):
        bound = 1.0 / jnp.sqrt(jnp.float32(fan_in))
        w = jax.random.uniform(kw, (fan_in, fan_out), jnp.float32, -bound, bound)
        b = jax.random.uniform(kb, (1, fan_out), jnp.float32, -bound, bound)
        return w, b

    w1, b1 = lin(ks[0], ks[1], in_features, hidden)
    w2, b2 = lin(ks[2], ks[3], hidden, hidden)
    w3, b3 = lin(ks[4], ks[5], hidden, num_beam)
    return {"w1": w1, "b1": b1, "w2": w2, "b2": b2, "w3": w3, "b3": b3}


if __name__ == "__main__":
    num_antenna = 8
    num_beam = 16
    in_features = 2 * num_antenna        # real+imag channel vector input

    key = jax.random.PRNGKey(0)
    kx1, kx2, kp = jax.random.split(key, 3)
    params = init_params(kp, in_features, num_antenna, num_beam)

    # Widened weights/biases built once and reused across calls.
    wide_params = prepare_widened_params(params, pack=8)

    def reference(x):
        # Plain JAX with the same precision recipe (bf16 operands, f32 accumulation).
        xb = x.astype(jnp.bfloat16)
        w1b, w2b, w3b = (params[k].astype(jnp.bfloat16) for k in ("w1", "w2", "w3"))
        b1, b2, b3 = params["b1"], params["b2"], params["b3"]
        h1 = jnp.maximum(jnp.dot(xb, w1b, preferred_element_type=jnp.float32) + b1, 0.0)
        h2 = jnp.maximum(jnp.dot(h1.astype(jnp.bfloat16), w2b,
                                 preferred_element_type=jnp.float32) + b2, 0.0)
        return jnp.dot(h2.astype(jnp.bfloat16), w3b,
                       preferred_element_type=jnp.float32) + b3

    # batch=12: tiny, single-step path (exercises padding 12 -> 16 rows).
    # batch=300: multi-step path (grid > 1, pipelined, megacore-shardable).
    for batch, kx in ((12, kx1), (300, kx2)):
        x = jax.random.normal(kx, (batch, in_features), dtype=jnp.float32)
        out = jax.block_until_ready(beam_classifier_forward(x, wide_params))
        ref = reference(x)
        assert out.shape == (batch, num_beam)
        assert jnp.allclose(out, ref, atol=2e-3, rtol=2e-3), \
            float(jnp.max(jnp.abs(out - ref)))

    print("KERNEL_OK")
</pallas_src>

<mosaic_0001>
module attributes {stable_mosaic.version = 11 : i64} {
  func.func @beam_classifier_kernel(%arg0: i32, %arg1: memref<2x128xf32, #tpu.memory_space<vmem>>, %arg2: memref<128x320xbf16, #tpu.memory_space<vmem>>, %arg3: memref<1x320xf32, #tpu.memory_space<vmem>>, %arg4: memref<320x320xbf16, #tpu.memory_space<vmem>>, %arg5: memref<1x320xf32, #tpu.memory_space<vmem>>, %arg6: memref<320x128xbf16, #tpu.memory_space<vmem>>, %arg7: memref<1x128xf32, #tpu.memory_space<vmem>>, %arg8: memref<2x128xf32, #tpu.memory_space<vmem>>) attributes {dimension_semantics = [#tpu.dimension_semantics<parallel>], iteration_bounds = array<i64: 1>, scalar_prefetch = 0 : i64, scratch_operands = 0 : i64, tpu.core_type = #tpu.core_type<tc>, window_params = [{transform_indices = @transform_0, window_bounds = array<i64: 2, 128>}, {pipeline_mode = #tpu.pipeline_mode<synchronous>, transform_indices = @transform_1, window_bounds = array<i64: 128, 320>}, {pipeline_mode = #tpu.pipeline_mode<synchronous>, transform_indices = @transform_2, window_bounds = array<i64: 1, 320>}, {pipeline_mode = #tpu.pipeline_mode<synchronous>, transform_indices = @transform_3, window_bounds = array<i64: 320, 320>}, {pipeline_mode = #tpu.pipeline_mode<synchronous>, transform_indices = @transform_4, window_bounds = array<i64: 1, 320>}, {pipeline_mode = #tpu.pipeline_mode<synchronous>, transform_indices = @transform_5, window_bounds = array<i64: 320, 128>}, {pipeline_mode = #tpu.pipeline_mode<synchronous>, transform_indices = @transform_6, window_bounds = array<i64: 1, 128>}, {transform_indices = @transform_7, window_bounds = array<i64: 2, 128>}]} {
    %c0 = arith.constant 0 : index
    %c0_0 = arith.constant 0 : index
    %0 = vector.load %arg1[%c0, %c0_0] : memref<2x128xf32, #tpu.memory_space<vmem>>, vector<2x128xf32>
    %1 = arith.truncf %0 : vector<2x128xf32> to vector<2x128xbf16>
    %c0_1 = arith.constant 0 : index
    %c0_2 = arith.constant 0 : index
    %2 = vector.load %arg2[%c0_1, %c0_2] : memref<128x320xbf16, #tpu.memory_space<vmem>>, vector<128x320xbf16>
    %cst = arith.constant dense<0.000000e+00> : vector<2x320xf32>
    %3 = tpu.matmul %1, %2, %cst {dimension_numbers = #tpu.dot_dimension_numbers<[1], [0], [0], [1], [0, 0, 1, 1], [], []>} : vector<2x128xbf16>, vector<128x320xbf16>, vector<2x320xf32> -> vector<2x320xf32>
    %c0_3 = arith.constant 0 : index
    %c0_4 = arith.constant 0 : index
    %4 = vector.load %arg3[%c0_3, %c0_4] : memref<1x320xf32, #tpu.memory_space<vmem>>, vector<1x320xf32>
    %5 = vector.broadcast %4 : vector<1x320xf32> to vector<2x320xf32>
    %6 = arith.addf %3, %5 : vector<2x320xf32>
    %cst_5 = arith.constant 0.000000e+00 : f32
    %7 = vector.broadcast %cst_5 : f32 to vector<2x320xf32>
    %8 = arith.maximumf %6, %7 : vector<2x320xf32>
    %9 = arith.truncf %8 : vector<2x320xf32> to vector<2x320xbf16>
    %c0_6 = arith.constant 0 : index
    %c0_7 = arith.constant 0 : index
    %10 = vector.load %arg4[%c0_6, %c0_7] : memref<320x320xbf16, #tpu.memory_space<vmem>>, vector<320x320xbf16>
    %cst_8 = arith.constant dense<0.000000e+00> : vector<2x320xf32>
    %11 = tpu.matmul %9, %10, %cst_8 {dimension_numbers = #tpu.dot_dimension_numbers<[1], [0], [0], [1], [0, 0, 1, 1], [], []>} : vector<2x320xbf16>, vector<320x320xbf16>, vector<2x320xf32> -> vector<2x320xf32>
    %c0_9 = arith.constant 0 : index
    %c0_10 = arith.constant 0 : index
    %12 = vector.load %arg5[%c0_9, %c0_10] : memref<1x320xf32, #tpu.memory_space<vmem>>, vector<1x320xf32>
    %13 = vector.broadcast %12 : vector<1x320xf32> to vector<2x320xf32>
    %14 = arith.addf %11, %13 : vector<2x320xf32>
    %cst_11 = arith.constant 0.000000e+00 : f32
    %15 = vector.broadcast %cst_11 : f32 to vector<2x320xf32>
    %16 = arith.maximumf %14, %15 : vector<2x320xf32>
    %17 = arith.truncf %16 : vector<2x320xf32> to vector<2x320xbf16>
    %c0_12 = arith.constant 0 : index
    %c0_13 = arith.constant 0 : index
    %18 = vector.load %arg6[%c0_12, %c0_13] : memref<320x128xbf16, #tpu.memory_space<vmem>>, vector<320x128xbf16>
    %cst_14 = arith.constant dense<0.000000e+00> : vector<2x128xf32>
    %19 = tpu.matmul %17, %18, %cst_14 {dimension_numbers = #tpu.dot_dimension_numbers<[1], [0], [0], [1], [0, 0, 1, 1], [], []>} : vector<2x320xbf16>, vector<320x128xbf16>, vector<2x128xf32> -> vector<2x128xf32>
    %c0_15 = arith.constant 0 : index
    %c0_16 = arith.constant 0 : index
    %20 = vector.load %arg7[%c0_15, %c0_16] : memref<1x128xf32, #tpu.memory_space<vmem>>, vector<1x128xf32>
    %21 = vector.broadcast %20 : vector<1x128xf32> to vector<2x128xf32>
    %22 = arith.addf %19, %21 : vector<2x128xf32>
    %c0_17 = arith.constant 0 : index
    %c0_18 = arith.constant 0 : index
    %23 = vector.load %arg8[%c0_17, %c0_18] : memref<2x128xf32, #tpu.memory_space<vmem>>, vector<2x128xf32>
    tpu.vector_store %arg8[%c0_17, %c0_18], %22 {strides = array<i32>} : memref<2x128xf32, #tpu.memory_space<vmem>>, vector<2x128xf32>,
    return
  }
  func.func @transform_0(%arg0: i32) -> (i32, i32) {
    %c0_i32 = arith.constant 0 : i32
    %c0_i32_0 = arith.constant 0 : i32
    return %arg0, %c0_i32 : i32, i32
  }
  func.func @transform_1(%arg0: i32) -> (i32, i32) {
    %c0_i32 = arith.constant 0 : i32
    %c0_i32_0 = arith.constant 0 : i32
    %c0_i32_1 = arith.constant 0 : i32
    return %c0_i32, %c0_i32_0 : i32, i32
  }
  func.func @transform_2(%arg0: i32) -> (i32, i32) {
    %c0_i32 = arith.constant 0 : i32
    %c0_i32_0 = arith.constant 0 : i32
    %c0_i32_1 = arith.constant 0 : i32
    return %c0_i32, %c0_i32_0 : i32, i32
  }
  func.func @transform_3(%arg0: i32) -> (i32, i32) {
    %c0_i32 = arith.constant 0 : i32
    %c0_i32_0 = arith.constant 0 : i32
    %c0_i32_1 = arith.constant 0 : i32
    return %c0_i32, %c0_i32_0 : i32, i32
  }
  func.func @transform_4(%arg0: i32) -> (i32, i32) {
    %c0_i32 = arith.constant 0 : i32
    %c0_i32_0 = arith.constant 0 : i32
    %c0_i32_1 = arith.constant 0 : i32
    return %c0_i32, %c0_i32_0 : i32, i32
  }
  func.func @transform_5(%arg0: i32) -> (i32, i32) {
    %c0_i32 = arith.constant 0 : i32
    %c0_i32_0 = arith.constant 0 : i32
    %c0_i32_1 = arith.constant 0 : i32
    return %c0_i32, %c0_i32_0 : i32, i32
  }
  func.func @transform_6(%arg0: i32) -> (i32, i32) {
    %c0_i32 = arith.constant 0 : i32
    %c0_i32_0 = arith.constant 0 : i32
    %c0_i32_1 = arith.constant 0 : i32
    return %c0_i32, %c0_i32_0 : i32, i32
  }
  func.func @transform_7(%arg0: i32) -> (i32, i32) {
    %c0_i32 = arith.constant 0 : i32
    %c0_i32_0 = arith.constant 0 : i32
    return %arg0, %c0_i32 : i32, i32
  }
}

</mosaic_0001>

<bundles_post_ra>
// kernel: tpu_custom_call.1
= control target key start
LH: loop header
LB: loop body
LE: loop exit
PB: predicated region body
PF: predicated region fallthrough
CT: control target
= control target key end

     0   :  { %12 = vsyncpa [#allocation3], 0  ;;  %s1806_s0 = inlined_call_operand.vmem [shape: f32[2,128], index: 0, kind: input, shape index: {}]   ;;  %s1807_s1 = inlined_call_operand.vmem [shape: bf16[128,320], index: 1, kind: input, shape index: {}]   ;;  %s1808_s2 = inlined_call_operand.vmem [shape: f32[1,320], index: 2, kind: input, shape index: {}]   ;;  %s1809_s3 = inlined_call_operand.hbm [shape: bf16[320,320], index: 3, kind: input, shape index: {}]   ;;  %s1810_s4 = inlined_call_operand.vmem [shape: f32[1,320], index: 4, kind: input, shape index: {}]   ;;  %s1811_s5 = inlined_call_operand.vmem [shape: bf16[320,128], index: 5, kind: input, shape index: {}]   ;;  %s1812_s6 = inlined_call_operand.vmem [shape: f32[1,128], index: 6, kind: input, shape index: {}]   ;;  %s1813_s7 = inlined_call_operand.hbm [shape: f32[2,128], index: 7, kind: output, shape index: {}]  }
   0x1   :  { %13 = vsyncpa [#allocation4], 0  ;;  %s1561_s24 = smov [#allocation2]  }
   0x2   :  { %s25_s25 = sshll.u32 %s1561_s24, 4  ;;  %s26_s25 = int_to_ptr.vmem [resolvable:$true] %s25_s25 }
   0x3   :  { %s1525_s26 = scalar_lea.vmem %s26_s25, 7680  ;;  %p1530_p1 = scmp.lt.s32.totalorder %s26_s25, %s26_s25 }
   0x4   :  { %p1526_p0 = scmp.ne.s32.totalorder %s26_s25, %s1525_s26  ;;  %p1531_p2 = scmp.lt.s32.totalorder %s1525_s26, %s1525_s26 }
   0x6   :  { %p1532_p3 = por %p1531_p2, %p1530_p1 }
   0x8   :  { %p1533_p4 = pnand %p1532_p3, %p1526_p0 }
   0xa   :  { %1536 = shalt.err (!%p1533_p4)
}
   0xb   :  { %s1562_s27 = smov 192   ;;  %s1563_s28 = smov 12  }
   0xc   :  { %31 = dma.hbm_to_vmem [thread:$0]  %s1809_s3, 7680, %s26_s25, [#allocation3], %s1562_s27, %s1562_s27, %s1563_s28  }
   0xd   :  { %1557 = dma.done.wait [#allocation3], 7680  }
   0xe   :  { %1558 = vsyncadd [#allocation3], 4294959616  ;;  %v1564_v0 = vmov 0.0   ;;  %vm1565_vm0 = vmmov 0   ;;  %v1566_v1 = vmov 0   ;;  %vm725_vm1 = vcmask 523264  }
   0xf   :  { %1334 = vmatprep.subr.bf16.mxu1 %v1564_v0  ;;  %1350 = vmatprep.mubr.msk.bf16.mxu1 %vm1565_vm0, %v1564_v0  ;;  %v1385_v2 = vld [vmem:[%s1807_s1 + $0xac] ss:$12 sps:$4 sm:$0xff]   ;;  %v1387_v3 = vld [vmem:[%s1807_s1 + $0xb0] ss:$12 sps:$4 sm:$0xff]   ;;  %v1388_v4 = vld [vmem:[%s1807_s1 + $0xa8] ss:$12 sps:$4 sm:$0xff]  }
  0x10   :  { %253 = vmatprep.mubr.bf16.mxu0 %v1566_v1  ;;  %221 = vmatprep.subr.bf16.mxu0 %v1385_v2  ;;  %v1389_v5 = vld [vmem:[%s1807_s1 + $0x94] ss:$12 sps:$4 sm:$0xff]   ;;  %v1391_v6 = vld [vmem:[%s1807_s1 + $0x98] ss:$12 sps:$4 sm:$0xff]   ;;  %v1392_v7 = vld [vmem:[%s1807_s1 + $0x90] ss:$12 sps:$4 sm:$0xff]  }
  0x11   :  { %1335 = vmatpush3.bf16.msra.mxu1 %v1387_v3  ;;  %222 = vmatpush1.bf16.msra.mxu0 %v1388_v4  ;;  %v1393_v8 = vld [vmem:[%s1807_s1 + $0x7c] ss:$12 sps:$4 sm:$0xff]   ;;  %v1395_v9 = vld [vmem:[%s1807_s1 + $0x80] ss:$12 sps:$4 sm:$0xff]   ;;  %v1396_v10 = vld [vmem:[%s1807_s1 + $0x78] ss:$12 sps:$4 sm:$0xff]  }
  0x12   :  { %1336 = vmatprep.subr.bf16.mxu1 %v1564_v0  ;;  %223 = vmatprep.subr.bf16.mxu0 %v1389_v5  ;;  %v1397_v11 = vld [vmem:[%s1807_s1 + $0x64] ss:$12 sps:$4 sm:$0xff]   ;;  %v1399_v12 = vld [vmem:[%s1807_s1 + $0x68] ss:$12 sps:$4 sm:$0xff]   ;;  %v1400_v13 = vld [vmem:[%s1807_s1 + $0x60] ss:$12 sps:$4 sm:$0xff]  }
  0x13   :  { %v1401_v14 = vld [vmem:[%s1807_s1 + $0x4c] ss:$12 sps:$4 sm:$0xff]   ;;  %v1403_v15 = vld [vmem:[%s1807_s1 + $0x50] ss:$12 sps:$4 sm:$0xff]   ;;  %v1404_v16 = vld [vmem:[%s1807_s1 + $0x48] ss:$12 sps:$4 sm:$0xff]  }
  0x14   :  { %v1405_v17 = vld [vmem:[%s1807_s1 + $0x34] ss:$12 sps:$4 sm:$0xff]   ;;  %v1407_v18 = vld [vmem:[%s1807_s1 + $0x38] ss:$12 sps:$4 sm:$0xff]   ;;  %v1408_v19 = vld [vmem:[%s1807_s1 + $0x30] ss:$12 sps:$4 sm:$0xff]  }
  0x15   :  { %1337 = vmatpush3.bf16.msra.mxu1 %v1391_v6  ;;  %224 = vmatpush1.bf16.msra.mxu0 %v1392_v7  ;;  %v1409_v20 = vld [vmem:[%s1807_s1 + $0x1c] ss:$12 sps:$4 sm:$0xff]   ;;  %v1411_v21 = vld [vmem:[%s1807_s1 + $0x20] ss:$12 sps:$4 sm:$0xff]   ;;  %v1412_v22 = vld [vmem:[%s1807_s1 + $0x18] ss:$12 sps:$4 sm:$0xff]   ;;  %v78_v7 = vlaneseq }
  0x16   :  { %1338 = vmatprep.subr.bf16.mxu1 %v1564_v0  ;;  %225 = vmatprep.subr.bf16.mxu0 %v1393_v8  ;;  %v1413_v23 = vld [vmem:[%s1807_s1 + $0x4] ss:$12 sps:$4 sm:$0xff]   ;;  %v1415_v24 = vld [vmem:[%s1807_s1 + $0x8] ss:$12 sps:$4 sm:$0xff]   ;;  %v42_v25 = vld [vmem:[%s1806_s0] sm:$0x3] }
  0x17   :  { %v1416_v26 = vld [vmem:[%s1807_s1] ss:$12 sps:$4 sm:$0xff]   ;;  %v43_v28 = vpack.c.bf16 %v42_v25, %v42_v25  ;;  %v1417_v29 = vld [vmem:[#allocation2 + $0xa8] ss:$12 sps:$4 sm:$0xff]   ;;  %v1420_v33 = vld [vmem:[#allocation2 + $0x90] ss:$12 sps:$4 sm:$0xff]  }
  0x18   :  { %v1419_v27 = vld [vmem:[#allocation2 + $0xac] ss:$12 sps:$4 sm:$0xff]   ;;  %v1422_v30 = vld [vmem:[#allocation2 + $0x94] ss:$12 sps:$4 sm:$0xff]   ;;  %v1425_v34 = vld [vmem:[#allocation2 + $0x7c] ss:$12 sps:$4 sm:$0xff]  }
  0x19   :  { %1339 = vmatpush3.bf16.msra.mxu1 %v1395_v9  ;;  %226 = vmatpush1.bf16.msra.mxu0 %v1396_v10  ;;  %v1450_v31 = vld [vmem:[#allocation2 + $0x1c8] ss:$12 sps:$4 sm:$0xff]   ;;  %v1452_v32 = vld [vmem:[#allocation2 + $0x1cc] ss:$12 sps:$4 sm:$0xff]   ;;  %v1456_v35 = vld [vmem:[#allocation2 + $0x1b0] ss:$12 sps:$4 sm:$0xff]  }
  0x1a   :  { %1340 = vmatprep.subr.bf16.mxu1 %v1564_v0  ;;  %227 = vmatprep.subr.bf16.mxu0 %v1397_v11  ;;  %v1458_v36 = vld [vmem:[#allocation2 + $0x1b4] ss:$12 sps:$4 sm:$0xff]   ;;  %v1423_v37 = vld [vmem:[#allocation2 + $0x78] ss:$12 sps:$4 sm:$0xff]   ;;  %v1464_v38 = vld [vmem:[#allocation2 + $0x19c] ss:$12 sps:$4 sm:$0xff]  }
  0x1b   :  { %v1428_v39 = vld [vmem:[#allocation2 + $0x64] ss:$12 sps:$4 sm:$0xff]   ;;  %v1426_v41 = vld [vmem:[#allocation2 + $0x60] ss:$12 sps:$4 sm:$0xff]   ;;  %v1429_v43 = vld [vmem:[#allocation2 + $0x48] ss:$12 sps:$4 sm:$0xff]  }
  0x1c   :  { %v1462_v40 = vld [vmem:[#allocation2 + $0x198] ss:$12 sps:$4 sm:$0xff]   ;;  %v1434_v44 = vld [vmem:[#allocation2 + $0x34] ss:$12 sps:$4 sm:$0xff]   ;;  %v1432_v45 = vld [vmem:[#allocation2 + $0x30] ss:$12 sps:$4 sm:$0xff]  }
  0x1d   :  { %1341 = vmatpush3.bf16.msra.mxu1 %v1399_v12  ;;  %228 = vmatpush1.bf16.msra.mxu0 %v1400_v13  ;;  %v1431_v42 = vld [vmem:[#allocation2 + $0x4c] ss:$12 sps:$4 sm:$0xff]   ;;  %v1437_v46 = vld [vmem:[#allocation2 + $0x1c] ss:$12 sps:$4 sm:$0xff]   ;;  %v1440_v48 = vld [vmem:[#allocation2 + $0x4] ss:$12 sps:$4 sm:$0xff]  }
  0x1e   :  { %1342 = vmatprep.subr.bf16.mxu1 %v1564_v0  ;;  %229 = vmatprep.subr.bf16.mxu0 %v1401_v14  ;;  %v1435_v47 = vld [vmem:[#allocation2 + $0x18] ss:$12 sps:$4 sm:$0xff]   ;;  %v1438_v49 = vld [vmem:[#allocation2] ss:$12 sps:$4 sm:$0xff]   ;;  %v1441_v51 = vld [vmem:[#allocation2 + $0x168] ss:$12 sps:$4 sm:$0xff]  }
  0x1f   :  { %v1443_v50 = vld [vmem:[#allocation2 + $0x16c] ss:$12 sps:$4 sm:$0xff]   ;;  %v1446_v52 = vld [vmem:[#allocation2 + $0x154] ss:$12 sps:$4 sm:$0xff]   ;;  %v1444_v53 = vld [vmem:[#allocation2 + $0x150] ss:$12 sps:$4 sm:$0xff]  }
  0x20   :  { %v1449_v54 = vld [vmem:[#allocation2 + $0x13c] ss:$12 sps:$4 sm:$0xff]   ;;  %v1447_v55 = vld [vmem:[#allocation2 + $0x138] ss:$12 sps:$4 sm:$0xff]   ;;  %v1453_v57 = vld [vmem:[#allocation2 + $0x120] ss:$12 sps:$4 sm:$0xff]  }
  0x21   :  { %1343 = vmatpush3.bf16.msra.mxu1 %v1403_v15  ;;  %230 = vmatpush1.bf16.msra.mxu0 %v1404_v16  ;;  %v1455_v56 = vld [vmem:[#allocation2 + $0x124] ss:$12 sps:$4 sm:$0xff]   ;;  %v1461_v58 = vld [vmem:[#allocation2 + $0x10c] ss:$12 sps:$4 sm:$0xff]   ;;  %v1459_v59 = vld [vmem:[#allocation2 + $0x108] ss:$12 sps:$4 sm:$0xff]  }
  0x22   :  { %1344 = vmatprep.subr.bf16.mxu1 %v1564_v0  ;;  %231 = vmatprep.subr.bf16.mxu0 %v1405_v17  ;;  %v1467_v60 = vld [vmem:[#allocation2 + $0xf4] ss:$12 sps:$4 sm:$0xff]   ;;  %v1465_v61 = vld [vmem:[#allocation2 + $0xf0] ss:$12 sps:$4 sm:$0xff]   ;;  %v1471_v2 = vld [vmem:[#allocation2 + $0xd8] ss:$12 sps:$4 sm:$0xff]  }
  0x23   :  { %v1470_v62 = vld [vmem:[#allocation2 + $0x184] ss:$12 sps:$4 sm:$0xff]   ;;  %v1468_v63 = vld [vmem:[#allocation2 + $0x180] ss:$12 sps:$4 sm:$0xff]   ;;  %v1497_v6 = vld [vmem:[%s1811_s5 + $0x78] sm:$0xff]   ;;  %v1701_v8 = vshrl.u32 %v78_v7, 7 }
  0x24   :  { %v1474_v3 = vld [vmem:[#allocation2 + $0x170] ss:$12 sps:$4 sm:$0xff]   ;;  %v1475_v5 = vld [vmem:[#allocation2 + $0xc0] ss:$12 sps:$4 sm:$0xff]   ;;  %s1567_s23 = smov [#allocation5]  }
  0x25   :  { %1345 = vmatpush3.bf16.msra.mxu1 %v1407_v18  ;;  %232 = vmatpush1.bf16.msra.mxu0 %v1408_v19  ;;  %v1477_v4 = vld [vmem:[#allocation2 + $0xc4] ss:$12 sps:$4 sm:$0xff]   ;;  %v88_v9 = vsub.s32 2, %v1701_v8  ;;  %v76_v10 = vld [vmem:[%s1808_s2] sm:$0x7]  ;;  %v80_v11 = vsub.s32 0, %v1701_v8 }
  0x26   :  { %1346 = vmatprep.subr.bf16.mxu1 %v1564_v0  ;;  %233 = vmatprep.subr.bf16.mxu0 %v1409_v20  ;;  %v84_v12 = vsub.s32 1, %v1701_v8  ;;  %v1516_v7 = vld [vmem:[%s1811_s5 + $0x80] sm:$0xff]   ;;  %s1154_s24 = sshll.u32 %s1567_s23, 4  ;;  %s1155_s24 = int_to_ptr.vmem [resolvable:$true] %s1154_s24 }
  0x27   :  { %v89_v13 = vrot.slane %v76_v10, %v88_v9  ;;  %v81_v14 = vrot.slane %v76_v10, %v80_v11  ;;  %v1249_v8 = vld [vmem:[%s1812_s6] ss:$0 sm:$0xff]  ;;  %s1537_s25 = scalar_lea.vmem %s1155_s24, 32  ;;  %p1542_p6 = scmp.lt.s32.totalorder %s1155_s24, %s1155_s24 }
  0x28   :  { %v85_v16 = vrot.slane %v76_v10, %v84_v12  ;;  %v388_v10 = vld [vmem:[%s1810_s4] sm:$0x7]  ;;  %p1538_p5 = scmp.ne.s32.totalorder %s1155_s24, %s1537_s25  ;;  %p1543_p7 = scmp.lt.s32.totalorder %s1537_s25, %s1537_s25 }
  0x29   :  { %1347 = vmatpush3.bf16.msra.mxu1 %v1411_v21  ;;  %234 = vmatpush1.bf16.msra.mxu0 %v1412_v22 }
  0x2a   :  { %1348 = vmatprep.subr.bf16.mxu1 %v1564_v0  ;;  %235 = vmatprep.subr.bf16.mxu0 %v1413_v23  ;;  %p1544_p8 = por %p1543_p7, %p1542_p6 }
  0x2c   :  { %p1545_p9 = pnand %p1544_p8, %p1538_p5 }
  0x2d   :  { %1349 = vmatpush3.bf16.msra.mxu1 %v1415_v24  ;;  %236 = vmatpush1.bf16.msra.mxu0 %v1416_v26  ;;  %v1478_v26 = vld [vmem:[#allocation2 + $0xb0] ss:$12 sps:$4 sm:$0xff]  }
  0x2e   :  { %729 = vmatprep.subr.bf16.mxu0 %v1419_v27  ;;  %778 = vmatprep.subr.bf16.mxu1 %v1452_v32 }
  0x30   :  { %1351 = vmatmul.mubr.bf16.vlgmr.msra.gmra.mxu1 %v43_v28  ;;  %254 = vmatmul.mubr.bf16.vlgmr.msra.gmra.mxu0 %v43_v28  ;;  %v1479_v28 = vld [vmem:[#allocation2 + $0x158] ss:$12 sps:$4 sm:$0xff]  }
  0x31   :  { %802 = vmatprep.mubr.bf16.mxu1 %v1566_v1  ;;  %730 = vmatpush1.bf16.msra.mxu0 %v1417_v29  ;;  %v1473_v1 = vld [vmem:[#allocation2 + $0xdc] ss:$12 sps:$4 sm:$0xff]  }
  0x32   :  { %731 = vmatprep.subr.bf16.mxu0 %v1422_v30  ;;  %779 = vmatpush1.bf16.msra.mxu1 %v1450_v31 }
  0x33   :  { %780 = vmatprep.subr.bf16.mxu1 %v1458_v36  ;;  %v1498_v36 = vld [vmem:[%s1811_s5 + $0x38] sm:$0xff]  }
  0x35   :  { %732 = vmatpush1.bf16.msra.mxu0 %v1420_v33 }
  0x36   :  { %733 = vmatprep.subr.bf16.mxu0 %v1425_v34  ;;  %781 = vmatpush1.bf16.msra.mxu1 %v1456_v35  ;;  %v1480_v35 = vld [vmem:[#allocation2 + $0x98] ss:$12 sps:$4 sm:$0xff]  }
  0x37   :  { %782 = vmatprep.subr.bf16.mxu1 %v1464_v38  ;;  %v1499_v38 = vld [vmem:[%s1811_s5 + $0x70] sm:$0xff]  }
  0x39   :  { %734 = vmatpush1.bf16.msra.mxu0 %v1423_v37  ;;  %v1481_v37 = vld [vmem:[#allocation2 + $0x140] ss:$12 sps:$4 sm:$0xff]  }
  0x3a   :  { %735 = vmatprep.subr.bf16.mxu0 %v1428_v39  ;;  %783 = vmatpush1.bf16.msra.mxu1 %v1462_v40  ;;  %v1482_v39 = vld [vmem:[#allocation2 + $0x80] ss:$12 sps:$4 sm:$0xff]   ;;  %v1500_v40 = vld [vmem:[%s1811_s5 + $0x30] sm:$0xff]  }
  0x3b   :  { %784 = vmatprep.subr.bf16.mxu1 %v1470_v62  ;;  %v1508_v62 = vld [vmem:[%s1811_s5 + $0x10] sm:$0xff]  }
  0x3d   :  { %736 = vmatpush1.bf16.msra.mxu0 %v1426_v41  ;;  %v1483_v41 = vld [vmem:[#allocation2 + $0x128] ss:$12 sps:$4 sm:$0xff]  }
  0x3e   :  { %737 = vmatprep.subr.bf16.mxu0 %v1431_v42  ;;  %785 = vmatpush1.bf16.msra.mxu1 %v1468_v63  ;;  %v1501_v42 = vld [vmem:[%s1811_s5 + $0x68] sm:$0xff]  }
  0x3f   :  { %1280 = vmatprep.subr.bf16.mxu1 %v1474_v3  ;;  %v1509_v63 = vld [vmem:[%s1811_s5 + $0x48] sm:$0xff]   ;;  %v1512_v3 = vld [vmem:[%s1811_s5] sm:$0xff]  }
  0x41   :  { %738 = vmatpush1.bf16.msra.mxu0 %v1429_v43  ;;  %v1484_v43 = vld [vmem:[#allocation2 + $0x68] ss:$12 sps:$4 sm:$0xff]  }
  0x42   :  { %739 = vmatprep.subr.bf16.mxu0 %v1434_v44  ;;  %v1502_v44 = vld [vmem:[%s1811_s5 + $0x28] sm:$0xff]  }
  0x45   :  { %740 = vmatpush1.bf16.msra.mxu0 %v1432_v45  ;;  %v1485_v45 = vld [vmem:[#allocation2 + $0x110] ss:$12 sps:$4 sm:$0xff]  }
  0x46   :  { %741 = vmatprep.subr.bf16.mxu0 %v1437_v46  ;;  %v1503_v46 = vld [vmem:[%s1811_s5 + $0x60] sm:$0xff]  }
  0x49   :  { %742 = vmatpush1.bf16.msra.mxu0 %v1435_v47  ;;  %v1486_v47 = vld [vmem:[#allocation2 + $0x50] ss:$12 sps:$4 sm:$0xff]  }
  0x4a   :  { %743 = vmatprep.subr.bf16.mxu0 %v1440_v48  ;;  %v1504_v48 = vld [vmem:[%s1811_s5 + $0x20] sm:$0xff]  }
  0x4d   :  { %744 = vmatpush1.bf16.msra.mxu0 %v1438_v49  ;;  %v1487_v49 = vld [vmem:[#allocation2 + $0xf8] ss:$12 sps:$4 sm:$0xff]  }
  0x4e   :  { %745 = vmatprep.subr.bf16.mxu0 %v1443_v50  ;;  %v1488_v50 = vld [vmem:[#allocation2 + $0x38] ss:$12 sps:$4 sm:$0xff]  }
  0x51   :  { %746 = vmatpush2.bf16.msra.mxu0 %v1441_v51  ;;  %v1489_v51 = vld [vmem:[#allocation2 + $0xe0] ss:$12 sps:$4 sm:$0xff]  }
  0x52   :  { %747 = vmatprep.subr.bf16.mxu0 %v1446_v52  ;;  %v1490_v52 = vld [vmem:[#allocation2 + $0x20] ss:$12 sps:$4 sm:$0xff]  }
  0x55   :  { %748 = vmatpush2.bf16.msra.mxu0 %v1444_v53  ;;  %v1491_v53 = vld [vmem:[#allocation2 + $0xc8] ss:$12 sps:$4 sm:$0xff]  }
  0x56   :  { %749 = vmatprep.subr.bf16.mxu0 %v1449_v54  ;;  %v1492_v54 = vld [vmem:[#allocation2 + $0x8] ss:$12 sps:$4 sm:$0xff]  }
  0x59   :  { %750 = vmatpush2.bf16.msra.mxu0 %v1447_v55  ;;  %v1493_v55 = vld [vmem:[#allocation2 + $0x1d0] ss:$12 sps:$4 sm:$0xff]  }
  0x5a   :  { %751 = vmatprep.subr.bf16.mxu0 %v1455_v56  ;;  %v1494_v56 = vld [vmem:[#allocation2 + $0x1b8] ss:$12 sps:$4 sm:$0xff]  }
  0x5d   :  { %752 = vmatpush2.bf16.msra.mxu0 %v1453_v57  ;;  %v1495_v57 = vld [vmem:[#allocation2 + $0x1a0] ss:$12 sps:$4 sm:$0xff]  }
  0x5e   :  { %753 = vmatprep.subr.bf16.mxu0 %v1461_v58  ;;  %v1496_v58 = vld [vmem:[#allocation2 + $0x188] ss:$12 sps:$4 sm:$0xff]  }
  0x61   :  { %754 = vmatpush2.bf16.msra.mxu0 %v1459_v59  ;;  %v1505_v59 = vld [vmem:[%s1811_s5 + $0x58] sm:$0xff]  }
  0x62   :  { %755 = vmatprep.subr.bf16.mxu0 %v1467_v60  ;;  %v1506_v60 = vld [vmem:[%s1811_s5 + $0x18] sm:$0xff]  }
  0x65   :  { %756 = vmatpush2.bf16.msra.mxu0 %v1465_v61  ;;  %v1507_v61 = vld [vmem:[%s1811_s5 + $0x50] sm:$0xff]  }
  0x66   :  { %757 = vmatprep.subr.bf16.mxu0 %v1473_v1  ;;  %v1510_v1 = vld [vmem:[%s1811_s5 + $0x8] sm:$0xff]  }
  0x69   :  { %758 = vmatpush2.bf16.msra.mxu0 %v1471_v2  ;;  %v1511_v2 = vld [vmem:[%s1811_s5 + $0x40] sm:$0xff]  }
  0x6a   :  { %759 = vmatprep.subr.bf16.mxu0 %v1477_v4  ;;  %v1513_v4 = vld [vmem:[%s1811_s5 + $0x98] sm:$0xff]  }
  0x6d   :  { %760 = vmatpush2.bf16.msra.mxu0 %v1475_v5  ;;  %v1514_v5 = vld [vmem:[%s1811_s5 + $0x90] sm:$0xff]  }
  0x6e   :  { %1307 = vmatprep.subr.bf16.mxu0 %v1497_v6  ;;  %v1515_v6 = vld [vmem:[%s1811_s5 + $0x88] sm:$0xff]  }
  0xf0   :  { %v296_v15 = vpop.f32.mrf.mxu1  ;;  %v255_v18 = vpop.f32.mrf.mxu0 }
  0xf1   :  { %v297_v17 = vadd.f32 %v296_v15, %v89_v13  ;;  %v256_v19 = vadd.f32 %v255_v18, %v81_v14  ;;  %v393_v14 = vrot.slane %v388_v10, %v80_v11 }
  0xf2   :  { %v1352_v20 = vpop.f32.mrf.mxu1  ;;  %v257_v22 = vpop.f32.mrf.mxu0 }
  0xf3   :  { %v304_v21 = vmax.f32 %v297_v17, 0.0  ;;  %v302_v23 = vmax.f32 %v256_v19, 0.0  ;;  %v258_v24 = vadd.f32 %v257_v22, %v85_v16  ;;  %v397_v16 = vrot.slane %v388_v10, %v84_v12 }
  0xf4   :  { %v299_v25 = vpop.f32.mrf.mxu1  ;;  %v259_v29 = vpop.f32.mrf.mxu0 }
  0xf5   :  { %v1715_v27 = vpack.c.bf16 %v304_v21, %v304_v21  ;;  %v303_v30 = vmax.f32 %v258_v24, 0.0  ;;  %v305_v32 = vpack.c.bf16 %v302_v23, %v302_v23 }
  0xf6   :  { %v1353_v31 = vpop.f32.mrf.mxu1  ;;  %v260_v33 = vpop.f32.mrf.mxu0 }
  0xf7   :  { %1247 = vmatmul.mubr.msk.bf16.vlgmr.msra.gmra.mxu1 %vm725_vm1, %v1715_v27  ;;  %v306_v34 = vpack.c.bf16 %v303_v30, %v303_v30  ;;  %v401_v33 = vrot.slane %v388_v10, %v88_v9 }
  0xf8   :  { %1281 = vmatpush3.bf16.msra.mxu1 %v1478_v26 }
  0xf9   :  { %1282 = vmatprep.subr.bf16.mxu1 %v1479_v28  ;;  %761 = vmatprep.mubr.bf16.mxu0 %v306_v34 }
  0xfa   :  { %843 = vmatprep.mubr.bf16.mxu1 %v306_v34  ;;  %762 = vmatmul.mubr.bf16.vlgmr.msra.gmra.mxu0 %v305_v32 }
  0xfb   :  { %1308 = vmatpush3.bf16.msra.mxu0 %v1498_v36 }
  0xfc   :  { %1283 = vmatpush3.bf16.msra.mxu1 %v1480_v35  ;;  %1309 = vmatprep.subr.bf16.mxu0 %v1499_v38 }
  0xfd   :  { %1284 = vmatprep.subr.bf16.mxu1 %v1481_v37 }
  0xff   :  { %1310 = vmatpush3.bf16.msra.mxu0 %v1500_v40 }
 0x100   :  { %1285 = vmatpush3.bf16.msra.mxu1 %v1482_v39  ;;  %1311 = vmatprep.subr.bf16.mxu0 %v1501_v42 }
 0x101   :  { %1286 = vmatprep.subr.bf16.mxu1 %v1483_v41 }
 0x103   :  { %1312 = vmatpush3.bf16.msra.mxu0 %v1502_v44 }
 0x104   :  { %1287 = vmatpush3.bf16.msra.mxu1 %v1484_v43  ;;  %1313 = vmatprep.subr.bf16.mxu0 %v1503_v46 }
 0x105   :  { %1288 = vmatprep.subr.bf16.mxu1 %v1485_v45 }
 0x107   :  { %1314 = vmatpush3.bf16.msra.mxu0 %v1504_v48 }
 0x108   :  { %1289 = vmatpush3.bf16.msra.mxu1 %v1486_v47  ;;  %1315 = vmatprep.subr.bf16.mxu0 %v1505_v59 }
 0x109   :  { %1290 = vmatprep.subr.bf16.mxu1 %v1487_v49 }
 0x10b   :  { %1316 = vmatpush3.bf16.msra.mxu0 %v1506_v60 }
 0x10c   :  { %1291 = vmatpush3.bf16.msra.mxu1 %v1488_v50  ;;  %1317 = vmatprep.subr.bf16.mxu0 %v1507_v61 }
 0x10d   :  { %1292 = vmatprep.subr.bf16.mxu1 %v1489_v51 }
 0x10f   :  { %1318 = vmatpush3.bf16.msra.mxu0 %v1508_v62 }
 0x110   :  { %1293 = vmatpush3.bf16.msra.mxu1 %v1490_v52  ;;  %1319 = vmatprep.subr.bf16.mxu0 %v1509_v63 }
 0x111   :  { %1294 = vmatprep.subr.bf16.mxu1 %v1491_v53 }
 0x113   :  { %1320 = vmatpush3.bf16.msra.mxu0 %v1510_v1 }
 0x114   :  { %1295 = vmatpush3.bf16.msra.mxu1 %v1492_v54  ;;  %1321 = vmatprep.subr.bf16.mxu0 %v1511_v2 }
 0x115   :  { %1354 = vmatprep.subr.bf16.mxu1 %v1564_v0 }
 0x117   :  { %844 = vmatmul.mubr.bf16.vlgmr.msra.gmra.mxu1 %v305_v32  ;;  %1322 = vmatpush3.bf16.msra.mxu0 %v1512_v3 }
 0x118   :  { %1355 = vmatpush3.bf16.msra.mxu1 %v1493_v55  ;;  %1362 = vmatprep.mubr.msk.bf16.mxu1 %vm1565_vm0, %v1564_v0 }
 0x119   :  { %1356 = vmatprep.subr.bf16.mxu1 %v1564_v0 }
 0x11c   :  { %1357 = vmatpush3.bf16.msra.mxu1 %v1494_v56 }
 0x11d   :  { %1358 = vmatprep.subr.bf16.mxu1 %v1564_v0 }
 0x120   :  { %1359 = vmatpush3.bf16.msra.mxu1 %v1495_v57 }
 0x121   :  { %1360 = vmatprep.subr.bf16.mxu1 %v1564_v0 }
 0x124   :  { %1361 = vmatpush3.bf16.msra.mxu1 %v1496_v58 }
 0x125   :  { %1366 = vmatprep.subr.bf16.mxu1 %v1564_v0 }
 0x127   :  { %1363 = vmatmul.mubr.msk.bf16.vlgmr.msra.gmra.mxu1 %vm725_vm1, %v1715_v27 }
 0x128   :  { %1374 = vmatprep.mubr.msk.bf16.mxu1 %vm1565_vm0, %v1564_v0  ;;  %1367 = vmatpush3.bf16.msra.mxu1 %v1513_v4 }
 0x129   :  { %1368 = vmatprep.subr.bf16.mxu1 %v1564_v0 }
 0x12c   :  { %1369 = vmatpush3.bf16.msra.mxu1 %v1514_v5 }
 0x12d   :  { %1370 = vmatprep.subr.bf16.mxu1 %v1564_v0 }
 0x130   :  { %1371 = vmatpush3.bf16.msra.mxu1 %v1515_v6 }
 0x131   :  { %1372 = vmatprep.subr.bf16.mxu1 %v1564_v0 }
 0x134   :  { %1373 = vmatpush3.bf16.msra.mxu1 %v1516_v7 }
 0x1b7   :  { %v804_v13 = vpop.f32.mrf.mxu1 }
 0x1b9   :  { %v806_v15 = vpop.f32.mrf.mxu1 }
 0x1ba   :  { %v763_v17 = vpop.f32.mrf.mxu0 }
 0x1bb   :  { %v808_v18 = vpop.f32.mrf.mxu1  ;;  %v764_v0 = vadd.f32 %v763_v17, %v393_v14 }
 0x1bc   :  { %v765_v19 = vpop.f32.mrf.mxu0 }
 0x1bd   :  { %v809_v20 = vpop.f32.mrf.mxu1  ;;  %v805_v21 = vadd.f32 %v804_v13, %v764_v0  ;;  %v766_v22 = vadd.f32 %v765_v19, %v397_v16 }
 0x1be   :  { %v767_v23 = vpop.f32.mrf.mxu0 }
 0x1bf   :  { %v807_v24 = vadd.f32 %v806_v15, %v766_v22  ;;  %v891_v25 = vmax.f32 %v805_v21, 0.0 }
 0x1c0   :  { %v768_v26 = vpop.f32.mrf.mxu0 }
 0x1c1   :  { %v892_v27 = vmax.f32 %v807_v24, 0.0  ;;  %v894_v29 = vpack.c.bf16 %v891_v25, %v891_v25 }
 0x1c3   :  { %v895_v28 = vpack.c.bf16 %v892_v27, %v892_v27 }
 0x1c5   :  { %1099 = vmatprep.mubr.bf16.mxu0 %v895_v28 }
 0x1c6   :  { %1100 = vmatmul.mubr.bf16.vlgmr.msra.gmra.mxu0 %v894_v29 }
 0x1d7   :  { %v1296_v11 = vpop.f32.mrf.mxu1 }
 0x1d9   :  { %v1297_v30 = vpop.f32.mrf.mxu1 }
 0x1da   :  { %v1298_v32 = vadd.f32 %v1297_v30, %v1296_v11 }
 0x1db   :  { %v1299_v31 = vpop.f32.mrf.mxu1 }
 0x1dc   :  { %v846_v34 = vadd.f32 %v1298_v32, %v401_v33 }
 0x1dd   :  { %v1300_v12 = vpop.f32.mrf.mxu1 }
 0x1e7   :  { %v885_v35 = vpop.f32.mrf.mxu1 }
 0x1e8   :  { %v886_v36 = vadd.f32 %v885_v35, %v846_v34 }
 0x1e9   :  { %v1364_v37 = vpop.f32.mrf.mxu1 }
 0x1ea   :  { %v893_v38 = vmax.f32 %v886_v36, 0.0 }
 0x1eb   :  { %v888_v39 = vpop.f32.mrf.mxu1 }
 0x1ec   :  { %v896_v40 = vpack.c.bf16 %v893_v38, %v893_v38 }
 0x1ed   :  { %v1365_v41 = vpop.f32.mrf.mxu1 }
 0x1ee   :  { %1375 = vmatmul.mubr.msk.bf16.vlgmr.msra.gmra.mxu1 %vm725_vm1, %v896_v40 }
 0x286   :  { %v1323_v42 = vpop.f32.mrf.mxu0 }
 0x288   :  { %v1324_v43 = vpop.f32.mrf.mxu0 }
 0x289   :  { %v1325_v46 = vadd.f32 %v1324_v43, %v1323_v42 }
 0x28a   :  { %v1326_v44 = vpop.f32.mrf.mxu0 }
 0x28b   :  { %v1102_v9 = vadd.f32 %v1325_v46, %v1249_v8 }
 0x28c   :  { %v1327_v45 = vpop.f32.mrf.mxu0 }
 0x2ae   :  { %v1141_v47 = vpop.f32.mrf.mxu1 }
 0x2af   :  { %v1142_v48 = vadd.f32 %v1141_v47, %v1102_v9 }
 0x2b0   :  { %v1376_v49 = vpop.f32.mrf.mxu1 }
 0x2b1   :  { %1147 = vst [vmem:[#allocation5] sm:$0x3] %v1142_v48 }
 0x2b2   :  { %v1144_v50 = vpop.f32.mrf.mxu1 }
 0x2b3   :  { %1548 = shalt.err (!%p1545_p9)
}
 0x2b4   :  { %1157 = dma.vmem_to_hbm [thread:$0]  %s1155_s24, 32, %s1813_s7, [#allocation4]   ;;  %v1377_v51 = vpop.f32.mrf.mxu1 }
 0x2b5   :  { %1559 = dma.done.wait [#allocation4], 32  }
 0x2b6   :  { %1560 = vsyncadd [#allocation4], 4294967264 }
 0x2b7   :  { %1161 = vsyncpa [#allocation3], 1 }
 0x2b8   :  { %1162 = vsyncpa [#allocation4], 1 }

</bundles_post_ra>
